<compile_context>
chip_gen: v6e
topology: v6e:2x2x1
jax: 0.10.0
libtpu: 0.0.40
codegen_flags: <defaults>
</compile_context>

<pallas_src>
import functools

import jax
import jax.numpy as jnp
from jax.experimental import pallas as pl
from jax.experimental.pallas import tpu as pltpu


def _round_up(x, m):
    return ((x + m - 1) // m) * m


def _gap_kernel(x_ref, o_ref, *, inv_hw):
    # x_ref: (TM, HW) tile in VMEM. Reduce over the lane (H*W) axis in f32.
    x = x_ref[...].astype(jnp.float32)
    s = jnp.sum(x, axis=-1)                       # (TM,) f32
    # Lane-dense write: one contiguous (1, TM) row per grid step. The
    # sublane->lane relayout rides the otherwise-idle XLU (kernel is mem-bound).
    o_ref[...] = (s * inv_hw).astype(o_ref.dtype).reshape(1, -1)


def _choose_row_tile(rows, hw, in_itemsize):
    # Packed-sublane alignment: f32 -> 8, bf16 -> 16, int8/fp8 -> 32 rows.
    packing = max(8, 32 // max(in_itemsize, 1))
    # ~8 MiB per (double-buffered) input block: big enough to amortize the
    # per-grid-step overhead at v7x bandwidth, small enough that two input
    # buffers (+ any compiler temporaries + tiny output buffers) stay well
    # under the 48 MiB VMEM limit requested below on every generation.
    budget = 8 * 1024 * 1024
    tm_budget = budget // max(hw * in_itemsize, 1)
    tm_budget = max(packing, (tm_budget // packing) * packing)
    # Keep at least 2 grid steps when possible so v7x's two TensorCores both
    # get work along the "parallel" row axis.
    tm_split = _round_up(max(-(-rows // 2), 1), packing)
    return int(max(packing, min(tm_budget, tm_split)))


def global_avg_pool2d(x):
    """Equivalent of F.avg_pool2d(x, kernel_size=x.shape[2:]) for NCHW input."""
    N, C, H, W = x.shape
    R, HW = N * C, H * W

    tm = _choose_row_tile(R, HW, jnp.dtype(x.dtype).itemsize)
    num_tiles = pl.cdiv(R, tm)

    xr = x.reshape(R, HW)                          # contiguous: free reshape

    kernel = functools.partial(_gap_kernel, inv_hw=1.0 / float(HW))

    out = pl.pallas_call(
        kernel,
        out_shape=jax.ShapeDtypeStruct((num_tiles, tm), x.dtype),
        grid=(num_tiles,),
        in_specs=[pl.BlockSpec((tm, HW), lambda i: (i, 0))],
        out_specs=pl.BlockSpec((1, tm), lambda i: (i, 0)),
        compiler_params=pltpu.CompilerParams(
            dimension_semantics=("parallel",),     # row tiles are independent
            vmem_limit_bytes=48 * 1024 * 1024,     # safe on v5e/v6e/v7x
        ),
    )(xr)

    # TODO(synk): for extreme spatial sizes (H*W so large that even a
    # `packing`-row tile exceeds the VMEM budget) add a trailing "arbitrary"
    # grid axis over H*W chunks with an f32 accumulator; unnecessary for
    # realistic GAP inputs.
    return out.reshape(num_tiles * tm)[:R].reshape(N, C, 1, 1)


if __name__ == "__main__":
    key = jax.random.PRNGKey(0)

    # Small NCHW input consistent with the module's forward.
    x = jax.random.normal(key, (2, 4, 16, 16), dtype=jnp.float32)
    y = jax.block_until_ready(global_avg_pool2d(x))
    ref = jnp.mean(x, axis=(2, 3), keepdims=True)
    assert y.shape == (2, 4, 1, 1), y.shape
    assert jnp.allclose(y, ref, atol=1e-5, rtol=1e-5)

    # N*C not a multiple of the packed sublane count (ragged block) + bf16.
    x2 = jax.random.normal(jax.random.PRNGKey(1), (3, 5, 7, 7), dtype=jnp.bfloat16)
    y2 = jax.block_until_ready(global_avg_pool2d(x2))
    ref2 = jnp.mean(x2.astype(jnp.float32), axis=(2, 3), keepdims=True)
    assert y2.shape == (3, 5, 1, 1), y2.shape
    assert jnp.allclose(y2.astype(jnp.float32), ref2, atol=1e-2, rtol=1e-2)

    # Multi-step grid (exercises the ragged-free cdiv path + lane-dense rows).
    x3 = jax.random.normal(jax.random.PRNGKey(2), (4, 32, 14, 14), dtype=jnp.float32)
    y3 = jax.block_until_ready(global_avg_pool2d(x3))
    ref3 = jnp.mean(x3, axis=(2, 3), keepdims=True)
    assert y3.shape == (4, 32, 1, 1), y3.shape
    assert jnp.allclose(y3, ref3, atol=1e-5, rtol=1e-5)

    print("KERNEL_OK")
</pallas_src>

<mosaic_0001>
module attributes {stable_mosaic.version = 11 : i64} {
  func.func @_gap_kernel(%arg0: i32, %arg1: memref<8x256xf32, #tpu.memory_space<vmem>>, %arg2: memref<1x8xf32, #tpu.memory_space<vmem>>) attributes {dimension_semantics = [#tpu.dimension_semantics<parallel>], iteration_bounds = array<i64: 1>, scalar_prefetch = 0 : i64, scratch_operands = 0 : i64, tpu.core_type = #tpu.core_type<tc>, window_params = [{transform_indices = @transform_0, window_bounds = array<i64: 8, 256>}, {transform_indices = @transform_1, window_bounds = array<i64: 1, 8>}]} {
    %c0 = arith.constant 0 : index
    %c0_0 = arith.constant 0 : index
    %0 = vector.load %arg1[%c0, %c0_0] : memref<8x256xf32, #tpu.memory_space<vmem>>, vector<8x256xf32>
    %cst = arith.constant dense<0.000000e+00> : vector<8xf32>
    %1 = vector.multi_reduction <add>, %0, %cst [1] : vector<8x256xf32> to vector<8xf32>
    %cst_1 = arith.constant 3.906250e-03 : f32
    %2 = vector.broadcast %cst_1 : f32 to vector<8xf32>
    %3 = arith.mulf %1, %2 : vector<8xf32>
    %4 = vector.shape_cast %3 : vector<8xf32> to vector<1x8xf32>
    %c0_2 = arith.constant 0 : index
    %c0_3 = arith.constant 0 : index
    %5 = vector.load %arg2[%c0_2, %c0_3] : memref<1x8xf32, #tpu.memory_space<vmem>>, vector<1x8xf32>
    tpu.vector_store %arg2[%c0_2, %c0_3], %4 {strides = array<i32>} : memref<1x8xf32, #tpu.memory_space<vmem>>, vector<1x8xf32>,
    return
  }
  func.func @transform_0(%arg0: i32) -> (i32, i32) {
    %c0_i32 = arith.constant 0 : i32
    %c0_i32_0 = arith.constant 0 : i32
    return %arg0, %c0_i32 : i32, i32
  }
  func.func @transform_1(%arg0: i32) -> (i32, i32) {
    %c0_i32 = arith.constant 0 : i32
    %c0_i32_0 = arith.constant 0 : i32
    return %arg0, %c0_i32 : i32, i32
  }
}

</mosaic_0001>

<bundles_post_ra>
// kernel: tpu_custom_call.1
= control target key start
LH: loop header
LB: loop body
LE: loop exit
PB: predicated region body
PF: predicated region fallthrough
CT: control target
= control target key end

     0   :  { %6 = vsyncpa [#allocation3], 0  ;;  %s116_s0 = inlined_call_operand.hbm [shape: f32[8,256], index: 0, kind: input, shape index: {}]   ;;  %s117_s1 = inlined_call_operand.hbm [shape: f32[1,8], index: 1, kind: output, shape index: {}]  }
   0x1   :  { %7 = vsyncpa [#allocation4], 0  ;;  %s98_s6 = smov [#allocation2]  }
   0x2   :  { %s14_s7 = sshll.u32 %s98_s6, 4  ;;  %s15_s7 = int_to_ptr.vmem [resolvable:$true] %s14_s7 }
   0x3   :  { %s62_s8 = scalar_lea.vmem %s15_s7, 256  ;;  %p67_p1 = scmp.lt.s32.totalorder %s15_s7, %s15_s7 }
   0x4   :  { %p63_p0 = scmp.ne.s32.totalorder %s15_s7, %s62_s8  ;;  %p68_p2 = scmp.lt.s32.totalorder %s62_s8, %s62_s8 }
   0x6   :  { %p69_p3 = por %p68_p2, %p67_p1 }
   0x8   :  { %p70_p4 = pnand %p69_p3, %p63_p0 }
   0xa   :  { %73 = shalt.err (!%p70_p4)
}
   0xb   :  { %17 = dma.hbm_to_vmem [thread:$0]  %s116_s0, 256, %s15_s7, [#allocation3]  }
   0xc   :  { %94 = dma.done.wait [#allocation3], 256  }
   0xd   :  { %95 = vsyncadd [#allocation3], 4294967040  ;;  %v21_v0 = vld [vmem:[#allocation2] sm:$0xff]  ;;  %v22_v1 = vld [vmem:[#allocation2 + $0x8] sm:$0xff]  ;;  %v28_v3 = vlaneseq  ;;  %s99_s11 = smov [#allocation5]   ;;  %vm35_vm0 = vcmask 57344  }
   0xe   :  { %v23_v2 = vadd.f32 %v22_v1, %v21_v0  ;;  %s43_s12 = sshll.u32 %s99_s11, 4  ;;  %s44_s12 = int_to_ptr.vmem [resolvable:$true] %s43_s12 }
   0xf   :  { %v29_v4 = vand.u32 127, %v28_v3  ;;  %v31_v5 = vshrl.u32 %v28_v3, 7  ;;  %s74_s13 = scalar_lea.vmem %s44_s12, 16  ;;  %s78_s0 = scalar_lea.vmem %s44_s12, 32 }
  0x10   :  { %24 = vadd.xlane.f32.xlu0 %v23_v2  ;;  %p75_p5 = scmp.ne.s32.totalorder %s44_s12, %s74_s13  ;;  %p79_p6 = scmp.lt.s32.totalorder %s44_s12, %s44_s12 }
  0x11   :  { %v32_v6 = vsub.s32 %v29_v4, %v31_v5  ;;  %p80_p7 = scmp.lt.s32.totalorder %s78_s0, %s74_s13 }
  0x13   :  { %p81_p8 = por %p80_p7, %p79_p6 }
  0x15   :  { %p82_p9 = pnand %p81_p8, %p75_p5 }
  0x99   :  { %v25_v7 = vpop.xlane.xlu0 %24 }
  0x9a   :  { %v26_v8 = vmul.f32 0.00390625, %v25_v7 }
  0x9c   :  { %v33_v9 = vrot.slane %v26_v8, %v32_v6 }
  0x9e   :  { %36 = vst.msk [vmem:[#allocation5] sm:$0x1] %vm35_vm0, %v33_v9 }
  0x9f   :  { %85 = shalt.err (!%p82_p9)
}
  0xa0   :  { %46 = dma.vmem_to_hbm [thread:$0]  %s44_s12, 16, %s117_s1, [#allocation4]  }
  0xa1   :  { %96 = dma.done.wait [#allocation4], 16  }
  0xa2   :  { %97 = vsyncadd [#allocation4], 4294967280 }
  0xa3   :  { %50 = vsyncpa [#allocation3], 1 }
  0xa4   :  { %51 = vsyncpa [#allocation4], 1 }

</bundles_post_ra>
